<compile_context>
chip_gen: v6e
topology: v6e:2x2x1
jax: 0.10.0
libtpu: 0.0.40
codegen_flags: <defaults>
</compile_context>

<pallas_src>
import functools

import jax
import jax.numpy as jnp
from jax import lax
from jax.experimental import pallas as pl
from jax.experimental.pallas import tpu as pltpu


def _round_up(x, m):
    return (x + m - 1) // m * m


def _pick_tile(total, cap, align):
    """Largest multiple of `align` that divides `total` and is <= cap."""
    best = align
    t = align
    while t <= min(total, cap):
        if total % t == 0:
            best = t
        t += align
    return best


# ---------------------------------------------------------------------------
# Pallas kernels
# ---------------------------------------------------------------------------
def _conv_caps_kernel(p_ref, w_ref, b_ref, o_ref, *, fuse_squash):
    # p_ref: (TM, TK) bf16   w_ref: (TK, TN) bf16   b_ref: (1, TN) f32
    # o_ref: (TM, TN) f32 — resident across the k (reduction) grid axis.
    k = pl.program_id(2)

    @pl.when(k == 0)
    def _():
        # Fold the bias into the accumulator init (no epilogue add needed).
        o_ref[...] = jnp.broadcast_to(b_ref[...], o_ref.shape)

    o_ref[...] += jnp.dot(p_ref[...], w_ref[...],
                          preferred_element_type=jnp.float32)

    if fuse_squash:
        # Capsule 8-vectors are 8 consecutive, 8-aligned sublanes at a fixed
        # column of this tile (requires Wo % 8 == 0; guarded in the wrapper).
        @pl.when(k == pl.num_programs(2) - 1)
        def _():
            n_groups = o_ref.shape[0] // 8

            def body(g, carry):
                i = pl.multiple_of(g * 8, 8)
                u = o_ref[pl.ds(i, 8), :]                       # (8, TN)
                sq = jnp.sum(u * u, axis=0, keepdims=True)      # (1, TN)
                scale = jnp.sqrt(sq) * pl.reciprocal(1.0 + sq, approx=True)
                o_ref[pl.ds(i, 8), :] = u * scale
                return carry

            lax.fori_loop(0, n_groups, body, 0, unroll=n_groups <= 8)


def _squash_kernel(u_ref, o_ref):
    # Fallback (Wo % 8 != 0): u_ref / o_ref are (8, TR), capsule vectors on
    # sublanes, rows lane-dense.
    u = u_ref[...]
    sq = jnp.sum(u * u, axis=0, keepdims=True)                  # (1, TR)
    scale = jnp.sqrt(sq) * pl.reciprocal(1.0 + sq, approx=True)
    o_ref[...] = u * scale


# ---------------------------------------------------------------------------
# Wrappers
# ---------------------------------------------------------------------------
def _im2col(x, k, stride):
    """x: (B, C, H, W) NCHW -> (B*Ho*Wo, C*k*k); columns flattened as
    (c, kh, kw) to match PyTorch Conv2d weight.reshape(Cout, Cin*k*k)."""
    B, C, H, W = x.shape
    Ho = (H - k) // stride + 1
    Wo = (W - k) // stride + 1
    cols = []
    for kh in range(k):
        for kw in range(k):
            cols.append(
                x[:, :, kh:kh + stride * Ho:stride, kw:kw + stride * Wo:stride]
            )  # (B, C, Ho, Wo)
    cols = jnp.stack(cols, axis=2)                      # (B, C, k*k, Ho, Wo)
    cols = cols.reshape(B, C * k * k, Ho, Wo)           # c*k*k + kh*k + kw
    cols = cols.transpose(0, 2, 3, 1).reshape(B * Ho * Wo, C * k * k)
    return cols, Ho, Wo


@functools.partial(jax.jit, static_argnames=("kernel_size", "stride",
                                             "num_capsules", "out_channels"))
def primary_caps_forward(x, weight, bias, *, kernel_size, stride,
                         num_capsules, out_channels):
    """x: (B, Cin, H, W); weight: (num_caps, out_ch, Cin, K, K);
    bias: (num_caps, out_ch).  Returns (B, -1, 8) squashed capsules."""
    B, cin, H, W = x.shape
    Ho = (H - kernel_size) // stride + 1
    Wo = (W - kernel_size) // stride + 1
    ckk = cin * kernel_size * kernel_size
    n_out = num_capsules * out_channels
    assert (n_out * Ho * Wo) % 8 == 0, "flat capsule size must divide by 8"

    # Fused squash needs each 8-group of the torch .view(B, -1, 8) flattening
    # to land on 8 consecutive, 8-aligned conv_out rows at a fixed column.
    fuse_squash = (Wo % 8 == 0)

    # TODO(synk): for production CapsNet shapes (9x9 kernels, 256 channels),
    # replace the HBM-materialized im2col with in-kernel strided-window
    # accumulation (grid over (kh, kw, Cin tiles)) to avoid K*K-fold
    # activation traffic.
    patches, Ho, Wo = _im2col(x.astype(jnp.bfloat16), kernel_size, stride)
    M = B * Ho * Wo

    # ---- tile geometry (lane-dense, MXU-friendly, VMEM-budgeted) ----
    Np = _round_up(n_out, 128)
    TN = _pick_tile(Np, 512, 256) if Np % 256 == 0 else _pick_tile(Np, 512, 128)
    Kp = _round_up(ckk, 128)
    TK = _pick_tile(Kp, 2816, 256) if Kp % 256 == 0 else _pick_tile(Kp, 2816, 128)
    TM = min(1024, _round_up(M, 8))
    Mp = _round_up(M, TM)
    # Small problems: keep >= 2 parallel (i, j) blocks so the second
    # TensorCore on v7x megacore is not idle (TM stays a multiple of 8).
    while (Mp // TM) * (Np // TN) < 2 and TM % 16 == 0 and TM >= 16:
        TM //= 2
        Mp = _round_up(M, TM)

    # VMEM working set: double-buffered bf16 inputs + resident f32 output.
    vmem_need = 2 * (TM * TK * 2 + TK * TN * 2 + TM * TN * 4 + TN * 4) + (2 << 20)
    vmem_limit = int(min(48 << 20, max(vmem_need, 16 << 20)))

    w_mat = weight.reshape(n_out, ckk).T.astype(jnp.bfloat16)   # (CKK, N)
    b_mat = bias.reshape(1, n_out).astype(jnp.float32)

    # Zero padding does not change the (sliced-off) result.
    patches_p = jnp.pad(patches, ((0, Mp - M), (0, Kp - ckk)))
    w_p = jnp.pad(w_mat, ((0, Kp - ckk), (0, Np - n_out)))
    b_p = jnp.pad(b_mat, ((0, 0), (0, Np - n_out)))

    conv_out = pl.pallas_call(
        functools.partial(_conv_caps_kernel, fuse_squash=fuse_squash),
        out_shape=jax.ShapeDtypeStruct((Mp, Np), jnp.float32),
        grid_spec=pltpu.PrefetchScalarGridSpec(
            num_scalar_prefetch=0,
            grid=(Mp // TM, Np // TN, Kp // TK),
            in_specs=[
                pl.BlockSpec((TM, TK), lambda i, j, k: (i, k)),
                pl.BlockSpec((TK, TN), lambda i, j, k: (k, j)),
                pl.BlockSpec((1, TN), lambda i, j, k: (0, j)),
            ],
            out_specs=pl.BlockSpec((TM, TN), lambda i, j, k: (i, j))),
        compiler_params=pltpu.CompilerParams(
            dimension_semantics=("parallel", "parallel", "arbitrary"),
            vmem_limit_bytes=vmem_limit),
    )(patches_p, w_p, b_p)

    # Back to the PyTorch stacking order (B, nc, oc, Ho, Wo), then capsule
    # vectors of 8 (same semantics as torch .view(B, -1, 8)).
    u = conv_out[:M, :n_out]
    u = u.reshape(B, Ho, Wo, num_capsules, out_channels)
    u = u.transpose(0, 3, 4, 1, 2)                    # (B, nc, oc, Ho, Wo)
    n_vec = (num_capsules * out_channels * Ho * Wo) // 8

    if fuse_squash:
        # squash already applied inside the matmul epilogue.
        return u.reshape(B, n_vec, 8)

    # Fallback path (Wo % 8 != 0): standalone squash kernel on an (8, rows)
    # slab with large lane-dense tiles (memory-bound; TR up to 32K).
    rows = B * n_vec
    u = u.reshape(rows, 8)
    TR = min(32768, _round_up(rows, 128))
    rows_p = _round_up(rows, TR)
    u_t = jnp.pad(u.T, ((0, 0), (0, rows_p - rows)))           # (8, rows_p)
    squashed_t = pl.pallas_call(
        _squash_kernel,
        out_shape=jax.ShapeDtypeStruct((8, rows_p), jnp.float32),
        grid_spec=pltpu.PrefetchScalarGridSpec(
            num_scalar_prefetch=0,
            grid=(rows_p // TR,),
            in_specs=[pl.BlockSpec((8, TR), lambda i: (0, i))],
            out_specs=pl.BlockSpec((8, TR), lambda i: (0, i))),
        compiler_params=pltpu.CompilerParams(
            dimension_semantics=("parallel",)),
    )(u_t)
    return squashed_t[:, :rows].T.reshape(B, n_vec, 8)


# ---------------------------------------------------------------------------
# Pure-JAX reference (exact PyTorch math, f32) for a sanity check.
# ---------------------------------------------------------------------------
def primary_caps_ref(x, weight, bias, *, kernel_size, stride,
                     num_capsules, out_channels):
    B, cin = x.shape[0], x.shape[1]
    ckk = cin * kernel_size * kernel_size
    patches, Ho, Wo = _im2col(x, kernel_size, stride)
    w_mat = weight.reshape(num_capsules * out_channels, ckk).T
    out = patches @ w_mat + bias.reshape(1, -1)
    u = out.reshape(B, Ho, Wo, num_capsules, out_channels)
    u = u.transpose(0, 3, 4, 1, 2).reshape(B, -1, 8)
    sq = jnp.sum(u * u, axis=-1, keepdims=True)
    return sq * u / ((1.0 + sq) * jnp.sqrt(sq))


if __name__ == "__main__":
    # Small shapes consistent with the module (capsule dim must be 8).
    # CKK = 32*3*3 = 288 -> Kp = 384 -> TK = 384 (single reduction step);
    # Ho = Wo = 8 -> fused squash path; M = 128 -> TM = 64 (2 parallel blocks).
    B, CIN, H, W = 2, 32, 17, 17
    NUM_CAPS, OUT_CH, K, STRIDE = 8, 4, 3, 2   # -> Ho = Wo = 8

    key = jax.random.PRNGKey(0)
    kx, kw, kb = jax.random.split(key, 3)
    x = jax.random.normal(kx, (B, CIN, H, W), dtype=jnp.float32)
    weight = 0.1 * jax.random.normal(
        kw, (NUM_CAPS, OUT_CH, CIN, K, K), dtype=jnp.float32)
    bias = 0.1 * jax.random.normal(kb, (NUM_CAPS, OUT_CH), dtype=jnp.float32)

    out = primary_caps_forward(
        x, weight, bias, kernel_size=K, stride=STRIDE,
        num_capsules=NUM_CAPS, out_channels=OUT_CH)
    out = jax.block_until_ready(out)

    ref = primary_caps_ref(
        x, weight, bias, kernel_size=K, stride=STRIDE,
        num_capsules=NUM_CAPS, out_channels=OUT_CH)

    Ho = (H - K) // STRIDE + 1
    Wo = (W - K) // STRIDE + 1
    assert out.shape == (B, NUM_CAPS * OUT_CH * Ho * Wo // 8, 8), out.shape
    max_err = float(jnp.max(jnp.abs(out - ref)))
    assert jnp.allclose(out, ref, rtol=2e-2, atol=2e-2), max_err

    print("KERNEL_OK")
</pallas_src>

<mosaic_0001>
module attributes {stable_mosaic.version = 11 : i64} {
  func.func @_conv_caps_kernel(%arg0: i32, %arg1: i32, %arg2: i32, %arg3: memref<64x384xbf16, #tpu.memory_space<vmem>>, %arg4: memref<384x128xbf16, #tpu.memory_space<vmem>>, %arg5: memref<1x128xf32, #tpu.memory_space<vmem>>, %arg6: memref<64x128xf32, #tpu.memory_space<vmem>>) attributes {dimension_semantics = [#tpu.dimension_semantics<parallel>, #tpu.dimension_semantics<parallel>, #tpu.dimension_semantics<arbitrary>], iteration_bounds = array<i64: 2, 1, 1>, scalar_prefetch = 0 : i64, scratch_operands = 0 : i64, tpu.core_type = #tpu.core_type<tc>, window_params = [{transform_indices = @transform_0, window_bounds = array<i64: 64, 384>}, {transform_indices = @transform_1, window_bounds = array<i64: 384, 128>}, {transform_indices = @transform_2, window_bounds = array<i64: 1, 128>}, {transform_indices = @transform_3, window_bounds = array<i64: 64, 128>}]} {
    %c0_i32 = arith.constant 0 : i32
    %0 = arith.cmpi eq, %arg2, %c0_i32 : i32
    %1 = arith.extui %0 : i1 to i32
    %c0_i32_0 = arith.constant 0 : i32
    %2 = arith.cmpi ne, %1, %c0_i32_0 : i32
    scf.if %2 {
      %c0_10 = arith.constant 0 : index
      %c0_11 = arith.constant 0 : index
      %12 = vector.load %arg5[%c0_10, %c0_11] : memref<1x128xf32, #tpu.memory_space<vmem>>, vector<1x128xf32>
      %13 = vector.shape_cast %12 : vector<1x128xf32> to vector<1x128xf32>
      %14 = vector.broadcast %13 : vector<1x128xf32> to vector<64x128xf32>
      %c0_12 = arith.constant 0 : index
      %c0_13 = arith.constant 0 : index
      %15 = vector.load %arg6[%c0_12, %c0_13] : memref<64x128xf32, #tpu.memory_space<vmem>>, vector<64x128xf32>
      tpu.vector_store %arg6[%c0_12, %c0_13], %14 {strides = array<i32>} : memref<64x128xf32, #tpu.memory_space<vmem>>, vector<64x128xf32>,
    } else {
    }
    %c0 = arith.constant 0 : index
    %c0_1 = arith.constant 0 : index
    %3 = vector.load %arg6[%c0, %c0_1] : memref<64x128xf32, #tpu.memory_space<vmem>>, vector<64x128xf32>
    %c0_2 = arith.constant 0 : index
    %c0_3 = arith.constant 0 : index
    %4 = vector.load %arg3[%c0_2, %c0_3] : memref<64x384xbf16, #tpu.memory_space<vmem>>, vector<64x384xbf16>
    %c0_4 = arith.constant 0 : index
    %c0_5 = arith.constant 0 : index
    %5 = vector.load %arg4[%c0_4, %c0_5] : memref<384x128xbf16, #tpu.memory_space<vmem>>, vector<384x128xbf16>
    %cst = arith.constant dense<0.000000e+00> : vector<64x128xf32>
    %6 = tpu.matmul %4, %5, %cst {dimension_numbers = #tpu.dot_dimension_numbers<[1], [0], [0], [1], [0, 0, 1, 1], [], []>} : vector<64x384xbf16>, vector<384x128xbf16>, vector<64x128xf32> -> vector<64x128xf32>
    %7 = arith.addf %3, %6 : vector<64x128xf32>
    %c0_6 = arith.constant 0 : index
    %c0_7 = arith.constant 0 : index
    %8 = vector.load %arg6[%c0_6, %c0_7] : memref<64x128xf32, #tpu.memory_space<vmem>>, vector<64x128xf32>
    tpu.vector_store %arg6[%c0_6, %c0_7], %7 {strides = array<i32>} : memref<64x128xf32, #tpu.memory_space<vmem>>, vector<64x128xf32>,
    %c0_i32_8 = arith.constant 0 : i32
    %9 = arith.cmpi eq, %arg2, %c0_i32_8 : i32
    %10 = arith.extui %9 : i1 to i32
    %c0_i32_9 = arith.constant 0 : i32
    %11 = arith.cmpi ne, %10, %c0_i32_9 : i32
    scf.if %11 {
      %c0_i32_10 = arith.constant 0 : i32
      %c8_i32 = arith.constant 8 : i32
      %12 = arith.muli %c0_i32_10, %c8_i32 : i32
      %13 = tpu.assume_multiple %12, 8 : i32
      %14 = arith.index_cast %13 : i32 to index
      %c0_11 = arith.constant 0 : index
      %15 = vector.load %arg6[%14, %c0_11] : memref<64x128xf32, #tpu.memory_space<vmem>>, vector<8x128xf32>
      %16 = arith.mulf %15, %15 : vector<8x128xf32>
      %cst_12 = arith.constant dense<0.000000e+00> : vector<128xf32>
      %17 = vector.multi_reduction <add>, %16, %cst_12 [0] : vector<8x128xf32> to vector<128xf32>
      %18 = vector.shape_cast %17 : vector<128xf32> to vector<1x128xf32>
      %19 = math.sqrt %18 : vector<1x128xf32>
      %cst_13 = arith.constant 1.000000e+00 : f32
      %20 = vector.broadcast %cst_13 : f32 to vector<1x128xf32>
      %21 = arith.addf %20, %18 : vector<1x128xf32>
      %22 = tpu.reciprocal %21 {approx = true} : vector<1x128xf32> -> vector<1x128xf32>
      %23 = arith.mulf %19, %22 : vector<1x128xf32>
      %24 = vector.broadcast %23 : vector<1x128xf32> to vector<8x128xf32>
      %25 = arith.mulf %15, %24 : vector<8x128xf32>
      %26 = arith.index_cast %13 : i32 to index
      %c0_14 = arith.constant 0 : index
      %27 = vector.load %arg6[%26, %c0_14] : memref<64x128xf32, #tpu.memory_space<vmem>>, vector<8x128xf32>
      tpu.vector_store %arg6[%26, %c0_14], %25 {strides = array<i32>} : memref<64x128xf32, #tpu.memory_space<vmem>>, vector<8x128xf32>,
      %c1_i32 = arith.constant 1 : i32
      %c8_i32_15 = arith.constant 8 : i32
      %28 = arith.muli %c1_i32, %c8_i32_15 : i32
      %29 = tpu.assume_multiple %28, 8 : i32
      %30 = arith.index_cast %29 : i32 to index
      %c0_16 = arith.constant 0 : index
      %31 = vector.load %arg6[%30, %c0_16] : memref<64x128xf32, #tpu.memory_space<vmem>>, vector<8x128xf32>
      %32 = arith.mulf %31, %31 : vector<8x128xf32>
      %cst_17 = arith.constant dense<0.000000e+00> : vector<128xf32>
      %33 = vector.multi_reduction <add>, %32, %cst_17 [0] : vector<8x128xf32> to vector<128xf32>
      %34 = vector.shape_cast %33 : vector<128xf32> to vector<1x128xf32>
      %35 = math.sqrt %34 : vector<1x128xf32>
      %cst_18 = arith.constant 1.000000e+00 : f32
      %36 = vector.broadcast %cst_18 : f32 to vector<1x128xf32>
      %37 = arith.addf %36, %34 : vector<1x128xf32>
      %38 = tpu.reciprocal %37 {approx = true} : vector<1x128xf32> -> vector<1x128xf32>
      %39 = arith.mulf %35, %38 : vector<1x128xf32>
      %40 = vector.broadcast %39 : vector<1x128xf32> to vector<8x128xf32>
      %41 = arith.mulf %31, %40 : vector<8x128xf32>
      %42 = arith.index_cast %29 : i32 to index
      %c0_19 = arith.constant 0 : index
      %43 = vector.load %arg6[%42, %c0_19] : memref<64x128xf32, #tpu.memory_space<vmem>>, vector<8x128xf32>
      tpu.vector_store %arg6[%42, %c0_19], %41 {strides = array<i32>} : memref<64x128xf32, #tpu.memory_space<vmem>>, vector<8x128xf32>,
      %c2_i32 = arith.constant 2 : i32
      %c8_i32_20 = arith.constant 8 : i32
      %44 = arith.muli %c2_i32, %c8_i32_20 : i32
      %45 = tpu.assume_multiple %44, 8 : i32
      %46 = arith.index_cast %45 : i32 to index
      %c0_21 = arith.constant 0 : index
      %47 = vector.load %arg6[%46, %c0_21] : memref<64x128xf32, #tpu.memory_space<vmem>>, vector<8x128xf32>
      %48 = arith.mulf %47, %47 : vector<8x128xf32>
      %cst_22 = arith.constant dense<0.000000e+00> : vector<128xf32>
      %49 = vector.multi_reduction <add>, %48, %cst_22 [0] : vector<8x128xf32> to vector<128xf32>
      %50 = vector.shape_cast %49 : vector<128xf32> to vector<1x128xf32>
      %51 = math.sqrt %50 : vector<1x128xf32>
      %cst_23 = arith.constant 1.000000e+00 : f32
      %52 = vector.broadcast %cst_23 : f32 to vector<1x128xf32>
      %53 = arith.addf %52, %50 : vector<1x128xf32>
      %54 = tpu.reciprocal %53 {approx = true} : vector<1x128xf32> -> vector<1x128xf32>
      %55 = arith.mulf %51, %54 : vector<1x128xf32>
      %56 = vector.broadcast %55 : vector<1x128xf32> to vector<8x128xf32>
      %57 = arith.mulf %47, %56 : vector<8x128xf32>
      %58 = arith.index_cast %45 : i32 to index
      %c0_24 = arith.constant 0 : index
      %59 = vector.load %arg6[%58, %c0_24] : memref<64x128xf32, #tpu.memory_space<vmem>>, vector<8x128xf32>
      tpu.vector_store %arg6[%58, %c0_24], %57 {strides = array<i32>} : memref<64x128xf32, #tpu.memory_space<vmem>>, vector<8x128xf32>,
      %c3_i32 = arith.constant 3 : i32
      %c8_i32_25 = arith.constant 8 : i32
      %60 = arith.muli %c3_i32, %c8_i32_25 : i32
      %61 = tpu.assume_multiple %60, 8 : i32
      %62 = arith.index_cast %61 : i32 to index
      %c0_26 = arith.constant 0 : index
      %63 = vector.load %arg6[%62, %c0_26] : memref<64x128xf32, #tpu.memory_space<vmem>>, vector<8x128xf32>
      %64 = arith.mulf %63, %63 : vector<8x128xf32>
      %cst_27 = arith.constant dense<0.000000e+00> : vector<128xf32>
      %65 = vector.multi_reduction <add>, %64, %cst_27 [0] : vector<8x128xf32> to vector<128xf32>
      %66 = vector.shape_cast %65 : vector<128xf32> to vector<1x128xf32>
      %67 = math.sqrt %66 : vector<1x128xf32>
      %cst_28 = arith.constant 1.000000e+00 : f32
      %68 = vector.broadcast %cst_28 : f32 to vector<1x128xf32>
      %69 = arith.addf %68, %66 : vector<1x128xf32>
      %70 = tpu.reciprocal %69 {approx = true} : vector<1x128xf32> -> vector<1x128xf32>
      %71 = arith.mulf %67, %70 : vector<1x128xf32>
      %72 = vector.broadcast %71 : vector<1x128xf32> to vector<8x128xf32>
      %73 = arith.mulf %63, %72 : vector<8x128xf32>
      %74 = arith.index_cast %61 : i32 to index
      %c0_29 = arith.constant 0 : index
      %75 = vector.load %arg6[%74, %c0_29] : memref<64x128xf32, #tpu.memory_space<vmem>>, vector<8x128xf32>
      tpu.vector_store %arg6[%74, %c0_29], %73 {strides = array<i32>} : memref<64x128xf32, #tpu.memory_space<vmem>>, vector<8x128xf32>,
      %c4_i32 = arith.constant 4 : i32
      %c8_i32_30 = arith.constant 8 : i32
      %76 = arith.muli %c4_i32, %c8_i32_30 : i32
      %77 = tpu.assume_multiple %76, 8 : i32
      %78 = arith.index_cast %77 : i32 to index
      %c0_31 = arith.constant 0 : index
      %79 = vector.load %arg6[%78, %c0_31] : memref<64x128xf32, #tpu.memory_space<vmem>>, vector<8x128xf32>
      %80 = arith.mulf %79, %79 : vector<8x128xf32>
      %cst_32 = arith.constant dense<0.000000e+00> : vector<128xf32>
      %81 = vector.multi_reduction <add>, %80, %cst_32 [0] : vector<8x128xf32> to vector<128xf32>
      %82 = vector.shape_cast %81 : vector<128xf32> to vector<1x128xf32>
      %83 = math.sqrt %82 : vector<1x128xf32>
      %cst_33 = arith.constant 1.000000e+00 : f32
      %84 = vector.broadcast %cst_33 : f32 to vector<1x128xf32>
      %85 = arith.addf %84, %82 : vector<1x128xf32>
      %86 = tpu.reciprocal %85 {approx = true} : vector<1x128xf32> -> vector<1x128xf32>
      %87 = arith.mulf %83, %86 : vector<1x128xf32>
      %88 = vector.broadcast %87 : vector<1x128xf32> to vector<8x128xf32>
      %89 = arith.mulf %79, %88 : vector<8x128xf32>
      %90 = arith.index_cast %77 : i32 to index
      %c0_34 = arith.constant 0 : index
      %91 = vector.load %arg6[%90, %c0_34] : memref<64x128xf32, #tpu.memory_space<vmem>>, vector<8x128xf32>
      tpu.vector_store %arg6[%90, %c0_34], %89 {strides = array<i32>} : memref<64x128xf32, #tpu.memory_space<vmem>>, vector<8x128xf32>,
      %c5_i32 = arith.constant 5 : i32
      %c8_i32_35 = arith.constant 8 : i32
      %92 = arith.muli %c5_i32, %c8_i32_35 : i32
      %93 = tpu.assume_multiple %92, 8 : i32
      %94 = arith.index_cast %93 : i32 to index
      %c0_36 = arith.constant 0 : index
      %95 = vector.load %arg6[%94, %c0_36] : memref<64x128xf32, #tpu.memory_space<vmem>>, vector<8x128xf32>
      %96 = arith.mulf %95, %95 : vector<8x128xf32>
      %cst_37 = arith.constant dense<0.000000e+00> : vector<128xf32>
      %97 = vector.multi_reduction <add>, %96, %cst_37 [0] : vector<8x128xf32> to vector<128xf32>
      %98 = vector.shape_cast %97 : vector<128xf32> to vector<1x128xf32>
      %99 = math.sqrt %98 : vector<1x128xf32>
      %cst_38 = arith.constant 1.000000e+00 : f32
      %100 = vector.broadcast %cst_38 : f32 to vector<1x128xf32>
      %101 = arith.addf %100, %98 : vector<1x128xf32>
      %102 = tpu.reciprocal %101 {approx = true} : vector<1x128xf32> -> vector<1x128xf32>
      %103 = arith.mulf %99, %102 : vector<1x128xf32>
      %104 = vector.broadcast %103 : vector<1x128xf32> to vector<8x128xf32>
      %105 = arith.mulf %95, %104 : vector<8x128xf32>
      %106 = arith.index_cast %93 : i32 to index
      %c0_39 = arith.constant 0 : index
      %107 = vector.load %arg6[%106, %c0_39] : memref<64x128xf32, #tpu.memory_space<vmem>>, vector<8x128xf32>
      tpu.vector_store %arg6[%106, %c0_39], %105 {strides = array<i32>} : memref<64x128xf32, #tpu.memory_space<vmem>>, vector<8x128xf32>,
      %c6_i32 = arith.constant 6 : i32
      %c8_i32_40 = arith.constant 8 : i32
      %108 = arith.muli %c6_i32, %c8_i32_40 : i32
      %109 = tpu.assume_multiple %108, 8 : i32
      %110 = arith.index_cast %109 : i32 to index
      %c0_41 = arith.constant 0 : index
      %111 = vector.load %arg6[%110, %c0_41] : memref<64x128xf32, #tpu.memory_space<vmem>>, vector<8x128xf32>
      %112 = arith.mulf %111, %111 : vector<8x128xf32>
      %cst_42 = arith.constant dense<0.000000e+00> : vector<128xf32>
      %113 = vector.multi_reduction <add>, %112, %cst_42 [0] : vector<8x128xf32> to vector<128xf32>
      %114 = vector.shape_cast %113 : vector<128xf32> to vector<1x128xf32>
      %115 = math.sqrt %114 : vector<1x128xf32>
      %cst_43 = arith.constant 1.000000e+00 : f32
      %116 = vector.broadcast %cst_43 : f32 to vector<1x128xf32>
      %117 = arith.addf %116, %114 : vector<1x128xf32>
      %118 = tpu.reciprocal %117 {approx = true} : vector<1x128xf32> -> vector<1x128xf32>
      %119 = arith.mulf %115, %118 : vector<1x128xf32>
      %120 = vector.broadcast %119 : vector<1x128xf32> to vector<8x128xf32>
      %121 = arith.mulf %111, %120 : vector<8x128xf32>
      %122 = arith.index_cast %109 : i32 to index
      %c0_44 = arith.constant 0 : index
      %123 = vector.load %arg6[%122, %c0_44] : memref<64x128xf32, #tpu.memory_space<vmem>>, vector<8x128xf32>
      tpu.vector_store %arg6[%122, %c0_44], %121 {strides = array<i32>} : memref<64x128xf32, #tpu.memory_space<vmem>>, vector<8x128xf32>,
      %c7_i32 = arith.constant 7 : i32
      %c8_i32_45 = arith.constant 8 : i32
      %124 = arith.muli %c7_i32, %c8_i32_45 : i32
      %125 = tpu.assume_multiple %124, 8 : i32
      %126 = arith.index_cast %125 : i32 to index
      %c0_46 = arith.constant 0 : index
      %127 = vector.load %arg6[%126, %c0_46] : memref<64x128xf32, #tpu.memory_space<vmem>>, vector<8x128xf32>
      %128 = arith.mulf %127, %127 : vector<8x128xf32>
      %cst_47 = arith.constant dense<0.000000e+00> : vector<128xf32>
      %129 = vector.multi_reduction <add>, %128, %cst_47 [0] : vector<8x128xf32> to vector<128xf32>
      %130 = vector.shape_cast %129 : vector<128xf32> to vector<1x128xf32>
      %131 = math.sqrt %130 : vector<1x128xf32>
      %cst_48 = arith.constant 1.000000e+00 : f32
      %132 = vector.broadcast %cst_48 : f32 to vector<1x128xf32>
      %133 = arith.addf %132, %130 : vector<1x128xf32>
      %134 = tpu.reciprocal %133 {approx = true} : vector<1x128xf32> -> vector<1x128xf32>
      %135 = arith.mulf %131, %134 : vector<1x128xf32>
      %136 = vector.broadcast %135 : vector<1x128xf32> to vector<8x128xf32>
      %137 = arith.mulf %127, %136 : vector<8x128xf32>
      %138 = arith.index_cast %125 : i32 to index
      %c0_49 = arith.constant 0 : index
      %139 = vector.load %arg6[%138, %c0_49] : memref<64x128xf32, #tpu.memory_space<vmem>>, vector<8x128xf32>
      tpu.vector_store %arg6[%138, %c0_49], %137 {strides = array<i32>} : memref<64x128xf32, #tpu.memory_space<vmem>>, vector<8x128xf32>,
      %c8_i32_50 = arith.constant 8 : i32
    } else {
    }
    return
  }
  func.func @transform_0(%arg0: i32, %arg1: i32, %arg2: i32) -> (i32, i32) {
    %c0_i32 = arith.constant 0 : i32
    return %arg0, %arg2 : i32, i32
  }
  func.func @transform_1(%arg0: i32, %arg1: i32, %arg2: i32) -> (i32, i32) {
    %c0_i32 = arith.constant 0 : i32
    return %arg2, %arg1 : i32, i32
  }
  func.func @transform_2(%arg0: i32, %arg1: i32, %arg2: i32) -> (i32, i32) {
    %c0_i32 = arith.constant 0 : i32
    %c0_i32_0 = arith.constant 0 : i32
    return %c0_i32, %arg1 : i32, i32
  }
  func.func @transform_3(%arg0: i32, %arg1: i32, %arg2: i32) -> (i32, i32) {
    %c0_i32 = arith.constant 0 : i32
    return %arg0, %arg1 : i32, i32
  }
}

</mosaic_0001>

<bundles_post_ra>
// kernel: primary_caps_forward.1
= control target key start
LH: loop header
LB: loop body
LE: loop exit
PB: predicated region body
PF: predicated region fallthrough
CT: control target
= control target key end

     0   :  { %s1278_s12 = smov 0   ;;  %s1280_s13 = smov 0   ;;  %s1512_s0 = inlined_call_operand.vmem [shape: bf16[128,384], index: 0, kind: input, shape index: {}]   ;;  %s1513_s1 = inlined_call_operand.vmem [shape: bf16[384,128], index: 1, kind: input, shape index: {}]   ;;  %s1514_s2 = inlined_call_operand.vmem [shape: f32[1,128], index: 2, kind: input, shape index: {}]   ;;  %s1515_s3 = inlined_call_operand.vmem [shape: f32[128,128], index: 3, kind: output, shape index: {}]  }
   0x1   :  { %s1282_s14 = smov 0  }
   0x2 LB: > { %s32_s15 = sadd.s32 1, %s1252_s13  ;;  %p1003_p0 = scmp.ge.s32.totalorder %s1256_s14, 1  ;;  %s1256_s14 = sphi %s1282_s14, %s13_s14   ;;  %s1252_s13 = sphi %s1280_s13, %s1517_s13   ;;  %s1248_s12 = sphi %s1278_s12, %s1516_s12  }
   0x3   : > { %p34_p1 = scmp.ge.s32.totalorder %s32_s15, 2  ;;  %p191_p2 = scmp.lt.s32.totalorder %s1256_s14, 3 }
   0x5   : > { %s1519_s15 = smov (%p34_p1, %s32_s15), 0  ;;  %p192_p3 = pnand %p1003_p0, %p191_p2 }
   0x6   : > { %s1004_s5 = sshll.u32 (!%p192_p3), %s1248_s12, 3 }
   0x7   : > { %195 = sbr.rel (%p192_p3) target bundleno = 312 (0x138), region = 32  ;;  %p236_p4 = scmp.lt.s32.totalorder (!%p192_p3), %s1004_s5, 15 }
   0xc   : > { %v1162_v0 = vld [vmem:[%s1513_s1 + $0x78] sm:$0xff]   ;;  %v1165_v3 = vld [vmem:[%s1513_s1 + $0x70] sm:$0xff]   ;;  %v1168_v6 = vld [vmem:[%s1513_s1 + $0x68] sm:$0xff]   ;;  %s1521_s5 = smov (!%p236_p4, %s1004_s5), 15 }
   0xd   : > { %v1163_v1 = vld [vmem:[%s1513_s1 + $0x38] sm:$0xff]   ;;  %1061 = vmatprep.subr.bf16.mxu0 %v1162_v0  ;;  %v1166_v4 = vld [vmem:[%s1513_s1 + $0x30] sm:$0xff]   ;;  %v1169_v7 = vld [vmem:[%s1513_s1 + $0x28] sm:$0xff]   ;;  %s1137_s27 = smul.u32 12, %s1521_s5  ;;  %s1007_s24 = sshll.u32 %s1521_s5, 3 }
   0xe   : > { %v1164_v2 = vld [vmem:[%s1513_s1 + $0xb8] sm:$0xff]   ;;  %1062 = vmatpush3.bf16.msra.mxu0 %v1163_v1  ;;  %v1167_v5 = vld [vmem:[%s1513_s1 + $0xb0] sm:$0xff]   ;;  %v1170_v8 = vld [vmem:[%s1513_s1 + $0xa8] sm:$0xff]   ;;  %s1463_s5 = scalar_lea.vmem %s1515_s3, %s1007_s24 }
   0xf   : > { %1113 = vmatprep.subr.bf16.mxu1 %v1164_v2  ;;  %1063 = vmatprep.subr.bf16.mxu0 %v1165_v3  ;;  %v1171_v9 = vld [vmem:[%s1513_s1 + $0x60] sm:$0xff]   ;;  %v1174_v12 = vld [vmem:[%s1513_s1 + $0x58] sm:$0xff]   ;;  %v1177_v15 = vld [vmem:[%s1513_s1 + $0x50] sm:$0xff]   ;;  %s1368_s16 = scalar_lea.vmem %s1512_s0, %s1137_s27 }
  0x10   : > { %1114 = vmatpush3.bf16.msra.mxu1 %v1164_v2  ;;  %v1172_v10 = vld [vmem:[%s1513_s1 + $0x20] sm:$0xff]   ;;  %v1176_v13 = vld [vmem:[%s1513_s1 + $0x98] sm:$0xff]   ;;  %v1179_v16 = vld [vmem:[%s1513_s1 + $0x90] sm:$0xff]  }
  0x11   : > { %1115 = vmatprep.subr.bf16.mxu1 %v1167_v5  ;;  %v1173_v11 = vld [vmem:[%s1513_s1 + $0xa0] sm:$0xff]   ;;  %v1175_v14 = vld [vmem:[%s1513_s1 + $0x18] sm:$0xff]   ;;  %v1178_v17 = vld [vmem:[%s1513_s1 + $0x10] sm:$0xff]  }
  0x12   : > { %1064 = vmatpush3.bf16.msra.mxu0 %v1166_v4  ;;  %v1180_v18 = vld [vmem:[%s1513_s1 + $0x48] sm:$0xff]   ;;  %v1183_v21 = vld [vmem:[%s1513_s1 + $0x40] sm:$0xff]   ;;  %v1198_v32 = vld [vmem:[%s1368_s16 + $0x50] ss:$12 sps:$4 sm:$0xff]  }
  0x13   : > { %1065 = vmatprep.subr.bf16.mxu0 %v1168_v6  ;;  %v1181_v19 = vld [vmem:[%s1513_s1 + $0x8] sm:$0xff]   ;;  %v1185_v22 = vld [vmem:[%s1513_s1 + $0x80] sm:$0xff]   ;;  %v1196_v33 = vld [vmem:[%s1368_s16 + $0x30] ss:$12 sps:$4 sm:$0xff]  }
  0x14   : > { %1116 = vmatpush3.bf16.msra.mxu1 %v1167_v5  ;;  %v1182_v20 = vld [vmem:[%s1513_s1 + $0x88] sm:$0xff]   ;;  %v1188_v23 = vld [vmem:[%s1368_s16 + $0x4] ss:$12 sps:$4 sm:$0xff]   ;;  %v1194_v31 = vld [vmem:[%s1368_s16 + $0x34] ss:$12 sps:$4 sm:$0xff]  }
  0x15   : > { %1117 = vmatprep.subr.bf16.mxu1 %v1170_v8  ;;  %v1189_v24 = vld [vmem:[%s1368_s16 + $0x8] ss:$12 sps:$4 sm:$0xff]   ;;  %v1184_v25 = vld [vmem:[%s1513_s1] sm:$0xff]   ;;  %599 = vmatprep.mubr.bf16.mxu0 %v1188_v23  ;;  %v1199_v34 = vld [vmem:[%s1368_s16 + $0x4c] ss:$12 sps:$4 sm:$0xff]  }
  0x16   : > { %1066 = vmatpush3.bf16.msra.mxu0 %v1169_v7  ;;  %1129 = vmatprep.mubr.bf16.mxu1 %v1189_v24  ;;  %v1186_v26 = vld [vmem:[%s1368_s16] ss:$12 sps:$4 sm:$0xff]   ;;  %v1191_v27 = vld [vmem:[%s1368_s16 + $0x1c] ss:$12 sps:$4 sm:$0xff]   ;;  %v1197_v29 = vld [vmem:[%s1368_s16 + $0x38] ss:$12 sps:$4 sm:$0xff]  }
  0x17   : > { %1067 = vmatprep.subr.bf16.mxu0 %v1171_v9  ;;  %v1190_v28 = vld [vmem:[%s1368_s16 + $0x20] ss:$12 sps:$4 sm:$0xff]   ;;  %v1193_v30 = vld [vmem:[%s1368_s16 + $0x18] ss:$12 sps:$4 sm:$0xff]   ;;  %v1201_v35 = vld [vmem:[%s1368_s16 + $0x48] ss:$12 sps:$4 sm:$0xff]  }
  0x18   : > { %1118 = vmatpush3.bf16.msra.mxu1 %v1170_v8  ;;  %v1394_v41 = vld [vmem:[%s1514_s2] ss:$0 sm:$0xff] }
  0x19   : > { %1119 = vmatprep.subr.bf16.mxu1 %v1173_v11 }
  0x1a   : > { %1068 = vmatpush3.bf16.msra.mxu0 %v1172_v10 }
  0x1b   : > { %1069 = vmatprep.subr.bf16.mxu0 %v1174_v12 }
  0x1c   : > { %1120 = vmatpush3.bf16.msra.mxu1 %v1173_v11 }
  0x1d   : > { %1121 = vmatprep.subr.bf16.mxu1 %v1176_v13 }
  0x1e   : > { %1070 = vmatpush3.bf16.msra.mxu0 %v1175_v14 }
  0x1f   : > { %1071 = vmatprep.subr.bf16.mxu0 %v1177_v15 }
  0x20   : > { %1122 = vmatpush3.bf16.msra.mxu1 %v1176_v13 }
  0x21   : > { %1123 = vmatprep.subr.bf16.mxu1 %v1179_v16 }
  0x22   : > { %1072 = vmatpush3.bf16.msra.mxu0 %v1178_v17 }
  0x23   : > { %1073 = vmatprep.subr.bf16.mxu0 %v1180_v18 }
  0x24   : > { %1124 = vmatpush3.bf16.msra.mxu1 %v1179_v16 }
  0x25   : > { %1125 = vmatprep.subr.bf16.mxu1 %v1182_v20 }
  0x26   : > { %1074 = vmatpush3.bf16.msra.mxu0 %v1181_v19 }
  0x27   : > { %1075 = vmatprep.subr.bf16.mxu0 %v1183_v21 }
  0x28   : > { %1126 = vmatpush3.bf16.msra.mxu1 %v1182_v20 }
  0x29   : > { %1127 = vmatprep.subr.bf16.mxu1 %v1185_v22 }
  0x2a   : > { %1076 = vmatpush3.bf16.msra.mxu0 %v1184_v25 }
  0x2c   : > { %1128 = vmatpush3.bf16.msra.mxu1 %v1185_v22 }
  0x2d   : > { %600 = vmatmul.mubr.bf16.vlgmr.msra.gmra.mxu0 %v1186_v26 }
  0x2e   : > { %607 = vmatprep.mubr.bf16.mxu0 %v1191_v27 }
  0x2f   : > { %1130 = vmatmul.mubr.bf16.vlgmr.msra.gmra.mxu1 %v1190_v28 }
  0x30   : > { %1133 = vmatprep.mubr.bf16.mxu1 %v1197_v29 }
  0x35   : > { %608 = vmatmul.mubr.bf16.gmra.mxu0 %v1193_v30 }
  0x36   : > { %615 = vmatprep.mubr.bf16.mxu0 %v1194_v31 }
  0x37   : > { %1134 = vmatmul.mubr.bf16.gmra.mxu1 %v1198_v32 }
  0x3d   : > { %616 = vmatmul.mubr.bf16.gmra.mxu0 %v1196_v33 }
  0x3e   : > { %623 = vmatprep.mubr.bf16.mxu0 %v1199_v34 }
  0x45   : > { %624 = vmatmul.mubr.bf16.gmra.mxu0 %v1201_v35 }
  0xed   : > { %v1077_v36 = vpop.f32.mrf.mxu0 }
  0xef   : > { %v1078_v37 = vpop.f32.mrf.mxu0  ;;  %v1131_v38 = vpop.f32.mrf.mxu1 }
  0xf0   : > { %v1079_v39 = vadd.f32 %v1078_v37, %v1077_v36 }
  0xf1   : > { %v1080_v40 = vpop.f32.mrf.mxu0  ;;  %v666_v42 = vpop.f32.mrf.mxu1 }
  0xf2   : > { %v667_v43 = vadd.f32 %v1079_v39, %v666_v42 }
  0xf3   : > { %v1081_v44 = vpop.f32.mrf.mxu0  ;;  %v1132_v45 = vpop.f32.mrf.mxu1 }
  0xf4   : > { %v1397_v46 = vadd.f32 %v1394_v41, %v667_v43  ;;  %v1082_v47 = vadd.f32 %v1081_v44, %v1080_v40 }
  0xf5   : > { %v1083_v48 = vpop.f32.mrf.mxu0  ;;  %v669_v49 = vpop.f32.mrf.mxu1 }
  0xf6   : > { %v717_v50 = vmul.f32 %v1397_v46, %v1397_v46  ;;  %v670_v51 = vadd.f32 %v1082_v47, %v669_v49 }
  0xf7   : > { %v1084_v52 = vpop.f32.mrf.mxu0  ;;  %v1135_v57 = vpop.f32.mrf.mxu1 }
  0xf8   : > { %v718_v53 = vrot.slane %v717_v50, 4  ;;  %v1402_v54 = vadd.f32 %v1394_v41, %v670_v51  ;;  %v1085_v55 = vadd.f32 %v1084_v52, %v1083_v48 }
  0xf9   : > { %v1086_v56 = vpop.f32.mrf.mxu0  ;;  %v682_v3 = vpop.f32.mrf.mxu1 }
  0xfa   : > { %v719_v58 = vadd.f32 %v718_v53, %v717_v50  ;;  %v738_v59 = vmul.f32 %v1402_v54, %v1402_v54  ;;  %v675_v60 = vadd.f32 %v1131_v38, %v1085_v55 }
  0xfb   : > { %v1087_v61 = vpop.f32.mrf.mxu0  ;;  %v1136_v15 = vpop.f32.mrf.mxu1 }
  0xfc   : > { %v720_v62 = vrot.slane %v719_v58, 2  ;;  %v739_v63 = vrot.slane %v738_v59, 4  ;;  %v1407_v0 = vadd.f32 %v1394_v41, %v675_v60  ;;  %v1088_v1 = vadd.f32 %v1087_v61, %v1086_v56 }
  0xfd   : > { %v1089_v2 = vpop.f32.mrf.mxu0  ;;  %v685_v27 = vpop.f32.mrf.mxu1 }
  0xfe   : > { %v721_v4 = vadd.f32 %v720_v62, %v719_v58  ;;  %v740_v5 = vadd.f32 %v739_v63, %v738_v59  ;;  %v759_v6 = vmul.f32 %v1407_v0, %v1407_v0  ;;  %v678_v7 = vadd.f32 %v1132_v45, %v1088_v1 }
  0xff   : > { %v1090_v8 = vpop.f32.mrf.mxu0 }
 0x100   : > { %v722_v9 = vrot.slane %v721_v4, 1  ;;  %v741_v10 = vrot.slane %v740_v5, 2  ;;  %v760_v11 = vrot.slane %v759_v6, 4  ;;  %v1412_v12 = vadd.f32 %v1394_v41, %v678_v7 }
 0x101   : > { %v1091_v13 = vadd.f32 %v1090_v8, %v1089_v2  ;;  %v1092_v14 = vpop.f32.mrf.mxu0 }
 0x102   : > { %v1414_v16 = vadd.f32 %v722_v9, %v721_v4  ;;  %v742_v17 = vadd.f32 %v741_v10, %v740_v5  ;;  %v761_v18 = vadd.f32 %v760_v11, %v759_v6  ;;  %v780_v19 = vmul.f32 %v1412_v12, %v1412_v12 }
 0x103   : > { %v683_v20 = vadd.f32 %v1091_v13, %v682_v3  ;;  %v1093_v21 = vpop.f32.mrf.mxu0 }
 0x104   : > { %1202 = vrsqrt.f32 %v1414_v16  ;;  %v731_v22 = vadd.f32 1.0, %v1414_v16  ;;  %v743_v23 = vrot.slane %v742_v17, 1  ;;  %v762_v24 = vrot.slane %v761_v18, 2 }
 0x105   : > { %v781_v25 = vrot.slane %v780_v19, 4  ;;  %v1095_v26 = vpop.f32.mrf.mxu0  ;;  %v1421_v28 = vadd.f32 %v1394_v41, %v683_v20  ;;  %v1094_v29 = vadd.f32 %v1093_v21, %v1092_v14  ;;  %vm726_vm0 = vcmp.eq.f32.partialorder %v1414_v16, inf }
 0x106   : > { %v1423_v30 = vadd.f32 %v743_v23, %v742_v17  ;;  %v763_v31 = vadd.f32 %v762_v24, %v761_v18  ;;  %1204 = vrcp.f32 %v731_v22  ;;  %vm728_vm1 = vcmp.eq.f32.partialorder %v1414_v16, 0.0 }
 0x107   : > { %v782_v32 = vadd.f32 %v781_v25, %v780_v19  ;;  %v1096_v33 = vpop.f32.mrf.mxu0  ;;  %v801_v34 = vmul.f32 %v1421_v28, %v1421_v28  ;;  %v686_v35 = vadd.f32 %v1094_v29, %v685_v27  ;;  %v729_v4 = vand.u32 2147483648, %v1414_v16 }
 0x108   : > { %v1097_v36 = vadd.f32 %v1096_v33, %v1095_v26  ;;  %1206 = vrsqrt.f32 %v1423_v30  ;;  %v752_v38 = vadd.f32 1.0, %v1423_v30  ;;  %v764_v39 = vrot.slane %v763_v31, 1 }
 0x109   : > { %v1098_v37 = vpop.f32.mrf.mxu0  ;;  %v783_v40 = vrot.slane %v782_v32, 2  ;;  %v802_v42 = vrot.slane %v801_v34, 4  ;;  %v1430_v43 = vadd.f32 %v1394_v41, %v686_v35  ;;  %vm747_vm2 = vcmp.eq.f32.partialorder %v1423_v30, inf }
 0x10a   : > { %v691_v44 = vadd.f32 %v1135_v57, %v1097_v36  ;;  %v1432_v47 = vadd.f32 %v764_v39, %v763_v31  ;;  %1208 = vrcp.f32 %v752_v38  ;;  %v750_v21 = vand.u32 2147483648, %v1423_v30 }
 0x10b   : > { %v1099_v45 = vpop.f32.mrf.mxu0  ;;  %v784_v48 = vadd.f32 %v783_v40, %v782_v32  ;;  %v803_v49 = vadd.f32 %v802_v42, %v801_v34  ;;  %v822_v50 = vmul.f32 %v1430_v43, %v1430_v43  ;;  %vm749_vm3 = vcmp.eq.f32.partialorder %v1423_v30, 0.0 }
 0x10c   : > { %v1437_v51 = vadd.f32 %v1394_v41, %v691_v44  ;;  %v1100_v52 = vadd.f32 %v1099_v45, %v1098_v37  ;;  %1210 = vrsqrt.f32 %v1432_v47  ;;  %v773_v53 = vadd.f32 1.0, %v1432_v47 }
 0x10d   : > { %v785_v55 = vrot.slane %v784_v48, 1  ;;  %v804_v56 = vrot.slane %v803_v49, 2  ;;  %v823_v57 = vrot.slane %v822_v50, 4  ;;  %vm768_vm4 = vcmp.eq.f32.partialorder %v1432_v47, inf }
 0x10e   : > { %v843_v58 = vmul.f32 %v1437_v51, %v1437_v51  ;;  %v694_v59 = vadd.f32 %v1136_v15, %v1100_v52  ;;  %1212 = vrcp.f32 %v773_v53  ;;  %vm770_vm5 = vcmp.eq.f32.partialorder %v1432_v47, 0.0 }
 0x10f   : > { %v1443_v61 = vadd.f32 %v785_v55, %v784_v48  ;;  %v805_v62 = vadd.f32 %v804_v56, %v803_v49  ;;  %v824_v63 = vadd.f32 %v823_v57, %v822_v50 }
 0x110   : > { %v844_v2 = vrot.slane %v843_v58, 4  ;;  %v1447_v3 = vadd.f32 %v1394_v41, %v694_v59 }
 0x111   : > { %v1203_v60 = vpop.eup %1202  ;;  %1214 = vrsqrt.f32 %v1443_v61  ;;  %v794_v6 = vadd.f32 1.0, %v1443_v61  ;;  %v806_v7 = vrot.slane %v805_v62, 1  ;;  %v825_v8 = vrot.slane %v824_v63, 2 }
 0x112   : > { %v725_v1 = vmul.f32 %v1203_v60, %v1414_v16  ;;  %v845_v11 = vadd.f32 %v844_v2, %v843_v58  ;;  %v864_v41 = vmul.f32 %v1447_v3, %v1447_v3  ;;  %vm789_vm6 = vcmp.eq.f32.partialorder %v1443_v61, inf }
 0x113   : > { %v1205_v9 = vpop.eup %1204  ;;  %v1458_v15 = vadd.f32 %v806_v7, %v805_v62  ;;  %v826_v17 = vadd.f32 %v825_v8, %v824_v63  ;;  %1216 = vrcp.f32 %v794_v6  ;;  %vm791_vm7 = vcmp.eq.f32.partialorder %v1443_v61, 0.0 }
 0x114   : > { %v727_v5 = vsel %vm726_vm0, %v1414_v16, %v725_v1  ;;  %v846_v18 = vrot.slane %v845_v11, 2  ;;  %v865_v19 = vrot.slane %v864_v41, 4 }
 0x115   : > { %v730_v10 = vsel %vm728_vm1, %v729_v4, %v727_v5  ;;  %v1207_v13 = vpop.eup %1206  ;;  %1218 = vrsqrt.f32 %v1458_v15  ;;  %v815_v23 = vadd.f32 1.0, %v1458_v15  ;;  %v827_v24 = vrot.slane %v826_v17, 1 }
 0x116   : > { %v733_v14 = vmul.f32 %v1205_v9, %v730_v10  ;;  %v746_v16 = vmul.f32 %v1207_v13, %v1423_v30  ;;  %v847_v27 = vadd.f32 %v846_v18, %v845_v11  ;;  %v866_v29 = vadd.f32 %v865_v19, %v864_v41 }
 0x117   : > { %v1209_v25 = vpop.eup %1208  ;;  %v828_v32 = vadd.f32 %v827_v24, %v826_v17  ;;  %1220 = vrcp.f32 %v815_v23  ;;  %vm810_vm8 = vcmp.eq.f32.partialorder %v1458_v15, inf  ;;  %v813_v62 = vand.u32 2147483648, %v1458_v15 }
 0x118   : > { %v734_v20 = vmul.f32 %v733_v14, %v1397_v46  ;;  %v748_v22 = vsel %vm747_vm2, %v1423_v30, %v746_v16  ;;  %v848_v34 = vrot.slane %v847_v27, 1  ;;  %v867_v35 = vrot.slane %v866_v29, 2 }
 0x119   : > { %v751_v26 = vsel %vm749_vm3, %v750_v21, %v748_v22  ;;  %v1211_v31 = vpop.eup %1210  ;;  %v771_v30 = vand.u32 2147483648, %v1432_v47  ;;  %1222 = vrsqrt.f32 %v828_v32  ;;  %v836_v38 = vadd.f32 1.0, %v828_v32 }
 0x11a   : > { %735 = vst [vmem:[%s1463_s5] sm:$0xff] %v734_v20  ;;  %v754_v46 = vmul.f32 %v1209_v25, %v751_v26  ;;  %v767_v33 = vmul.f32 %v1211_v31, %v1432_v47  ;;  %v849_v39 = vadd.f32 %v848_v34, %v847_v27  ;;  %v868_v44 = vadd.f32 %v867_v35, %v866_v29 }
 0x11b   : > { %v1213_v40 = vpop.eup %1212  ;;  %1224 = vrcp.f32 %v836_v38  ;;  %vm812_vm9 = vcmp.eq.f32.partialorder %v1458_v15, 0.0  ;;  %vm831_vm10 = vcmp.eq.f32.partialorder %v828_v32, inf  ;;  %vm833_vm11 = vcmp.eq.f32.partialorder %v828_v32, 0.0 }
 0x11c   : > { %v755_v36 = vmul.f32 %v754_v46, %v1402_v54  ;;  %v769_v37 = vsel %vm768_vm4, %v1432_v47, %v767_v33  ;;  %1226 = vrsqrt.f32 %v849_v39  ;;  %v857_v49 = vadd.f32 1.0, %v849_v39 }
 0x11d   : > { %v772_v42 = vsel %vm770_vm5, %v771_v30, %v769_v37  ;;  %v792_v47 = vand.u32 2147483648, %v1443_v61  ;;  %v869_v52 = vrot.slane %v868_v44, 1  ;;  %vm852_vm12 = vcmp.eq.f32.partialorder %v849_v39, inf }
 0x11e   : > { %1046 = vst [vmem:[%s1463_s5 + $0x8] sm:$0xff] %v755_v36  ;;  %v1215_v45 = vpop.eup %1214  ;;  %v775_v48 = vmul.f32 %v1213_v40, %v772_v42  ;;  %1228 = vrcp.f32 %v857_v49  ;;  %v855_v14 = vand.u32 2147483648, %v849_v39  ;;  %vm854_vm13 = vcmp.eq.f32.partialorder %v849_v39, 0.0 }
 0x11f   : > { %v788_v54 = vmul.f32 %v1215_v45, %v1443_v61  ;;  %v870_v57 = vadd.f32 %v869_v52, %v868_v44 }
 0x120   : > { %v776_v50 = vmul.f32 %v775_v48, %v1407_v0  ;;  %v1217_v55 = vpop.eup %1216 }
 0x121   : > { %v790_v53 = vsel %vm789_vm6, %v1443_v61, %v788_v54  ;;  %1230 = vrsqrt.f32 %v870_v57  ;;  %v878_v63 = vadd.f32 1.0, %v870_v57  ;;  %vm873_vm14 = vcmp.eq.f32.partialorder %v870_v57, inf }
 0x122   : > { %1048 = vst [vmem:[%s1463_s5 + $0x10] sm:$0xff] %v776_v50  ;;  %v793_v56 = vsel %vm791_vm7, %v792_v47, %v790_v53  ;;  %v1219_v58 = vpop.eup %1218  ;;  %v876_v22 = vand.u32 2147483648, %v870_v57  ;;  %vm875_vm15 = vcmp.eq.f32.partialorder %v870_v57, 0.0 }
 0x123   : > { %v796_v59 = vmul.f32 %v1217_v55, %v793_v56  ;;  %v809_v60 = vmul.f32 %v1219_v58, %v1458_v15  ;;  %1232 = vrcp.f32 %v878_v63 }
 0x124   : > { %v1221_v1 = vpop.eup %1220 }
 0x125   : > { %v797_v0 = vmul.f32 %v796_v59, %v1412_v12  ;;  %v811_v61 = vsel %vm810_vm8, %v1458_v15, %v809_v60  ;;  %v834_v12 = vand.u32 2147483648, %v828_v32 }
 0x126   : > { %v814_v2 = vsel %vm812_vm9, %v813_v62, %v811_v61  ;;  %v1223_v4 = vpop.eup %1222 }
 0x127   : > { %1050 = vst [vmem:[%s1463_s5 + $0x18] sm:$0xff] %v797_v0  ;;  %v817_v5 = vmul.f32 %v1221_v1, %v814_v2  ;;  %v830_v6 = vmul.f32 %v1223_v4, %v828_v32 }
 0x128   : > { %v1225_v8 = vpop.eup %1224 }
 0x129   : > { %v818_v7 = vmul.f32 %v817_v5, %v1421_v28  ;;  %v832_v9 = vsel %vm831_vm10, %v828_v32, %v830_v6  ;;  %v1227_v10 = vpop.eup %1226 }
 0x12a   : > { %v835_v11 = vsel %vm833_vm11, %v834_v12, %v832_v9  ;;  %v851_v13 = vmul.f32 %v1227_v10, %v849_v39 }
 0x12b   : > { %1052 = vst [vmem:[%s1463_s5 + $0x20] sm:$0xff] %v818_v7  ;;  %v838_v41 = vmul.f32 %v1225_v8, %v835_v11  ;;  %v1229_v16 = vpop.eup %1228 }
 0x12c   : > { %v853_v17 = vsel %vm852_vm12, %v849_v39, %v851_v13 }
 0x12d   : > { %v839_v15 = vmul.f32 %v838_v41, %v1430_v43  ;;  %v856_v28 = vsel %vm854_vm13, %v855_v14, %v853_v17 }
 0x12e   : > { %v1231_v18 = vpop.eup %1230  ;;  %v859_v19 = vmul.f32 %v1229_v16, %v856_v28 }
 0x12f   : > { %1054 = vst [vmem:[%s1463_s5 + $0x28] sm:$0xff] %v839_v15  ;;  %v872_v20 = vmul.f32 %v1231_v18, %v870_v57 }
 0x130   : > { %v860_v21 = vmul.f32 %v859_v19, %v1437_v51  ;;  %v1233_v24 = vpop.eup %1232 }
 0x131   : > { %v874_v23 = vsel %vm873_vm14, %v870_v57, %v872_v20 }
 0x132   : > { %1056 = vst [vmem:[%s1463_s5 + $0x30] sm:$0xff] %v860_v21  ;;  %v877_v25 = vsel %vm875_vm15, %v876_v22, %v874_v23 }
 0x133   : > { %v880_v26 = vmul.f32 %v1233_v24, %v877_v25 }
 0x135   : > { %v881_v43 = vmul.f32 %v880_v26, %v1447_v3 }
 0x137   : > { %1058 = vst [vmem:[%s1463_s5 + $0x38] sm:$0xff] %v881_v43 }
 0x138 PF: > { %s13_s14 = sadd.s32 1, %s1256_s14   ;;  %s1516_s12 = smov %s1252_s13 }
 0x139   : > { %p10_p5 = scmp.ge.s32.totalorder %s13_s14, 4   ;;  %s1517_s13 = smov %s1519_s15 }
 0x13b   :  { %12 = sbr.rel (!%p10_p5) target bundleno = 2 (0x2), region = 83 }

</bundles_post_ra>
